<compile_context>
chip_gen: v5e
topology: v5e:2x2
jax: 0.10.0
libtpu: 0.0.40
codegen_flags: <defaults>
</compile_context>

<pallas_src>
import functools

import jax
import jax.numpy as jnp
import numpy as np
from jax import lax
from jax.experimental import pallas as pl
from jax.experimental.pallas import tpu as pltpu


def rnc_loss_kernel(wt_ref, mt_ref, lab_col_ref, lab_row_ref, sq_row_ref,
                    out_ref, f_s, acc_s, *, n, nb, ti, tk, temperature):
    i = pl.program_id(0)

    # One-time setup (grid axis is sequential / "arbitrary"): build the
    # concatenated feature matrix once in VMEM scratch and zero the accumulator.
    @pl.when(i == 0)
    def _():
        f_s[0:nb, :] = wt_ref[...].astype(jnp.float32)
        f_s[nb:n, :] = mt_ref[...].astype(jnp.float32)
        acc_s[...] = jnp.zeros_like(acc_s)

    r0 = pl.multiple_of(i * ti, ti)
    q = f_s[pl.ds(r0, ti), :]                                     # (ti, D)

    # Gram block on the MXU: g[r, j] = <q_r, f_j>   (contract last dims).
    g = lax.dot_general(q, f_s[...], (((1,), (1,)), ((), ())),
                        preferred_element_type=jnp.float32)        # (ti, n)

    sq_q = jnp.sum(q * q, axis=1, keepdims=True)                   # (ti, 1)
    sq_row = sq_row_ref[...]                                       # (1, n)

    grow = lax.broadcasted_iota(jnp.int32, (ti, n), 0) + r0        # global row
    gcol = lax.broadcasted_iota(jnp.int32, (ti, n), 1)             # global col
    is_diag = grow == gcol

    # -L2 distance / T; force diag d2 to exactly 0 (see header note).
    d2 = jnp.maximum(sq_q + sq_row - 2.0 * g, 0.0)
    d2 = jnp.where(is_diag, 0.0, d2)
    logits = -jnp.sqrt(d2) / jnp.float32(temperature)              # (ti, n)
    e = jnp.exp(logits)                                            # (ti, n)

    lab_q = lab_col_ref[pl.ds(r0, ti), :].astype(jnp.float32)      # (ti, 1)
    ld = jnp.abs(lab_q - lab_row_ref[...].astype(jnp.float32))     # (ti, n)

    # Positive-logit contribution: diagonal logits are exactly 0 -> full sum.
    pos_blk = jnp.sum(logits)

    # Fused, k-blocked denominator (never materialize a (ti, n, n) slab):
    #   denom[r, k] = sum_j [ld[r, j] >= ld[r, k]] * e[r, j]  -  [ld[r, k] == 0]
    # The subtracted 2-D term is the exact j == i self-term (e[r,i] == 1 and
    # ld[r,i] == 0 >= ld[r,k] iff ld[r,k] == 0); keep it on the VPU (an MXU
    # rewrite would have M=1 per row and waste the systolic array).
    log_denom_blk = jnp.float32(0.0)
    for kb in range(n // tk):                  # static: lane slices need const k0
        k0 = kb * tk
        ld_k = ld[:, k0:k0 + tk]                                   # (ti, tk)
        mask = ld[:, None, :] >= ld_k[:, :, None]                  # (ti, tk, n)
        denom = jnp.sum(jnp.where(mask, e[:, None, :], 0.0), axis=2)
        denom = denom - jnp.where(ld_k == 0.0, 1.0, 0.0)           # (ti, tk)
        off = jnp.logical_not(is_diag[:, k0:k0 + tk])
        log_denom_blk = log_denom_blk + jnp.sum(jnp.where(off, jnp.log(denom), 0.0))

    acc_s[...] = acc_s[...] + (pos_blk - log_denom_blk)

    @pl.when(i == pl.num_programs(0) - 1)
    def _():
        out_ref[0, 0] = -jnp.sum(acc_s[...]) / jnp.float32(n * (n - 1))


def rnc_loss(wt_emb, mt_emb, label_wt, label_mt, temperature=2.0, ti=None, tk=None):
    b, d = wt_emb.shape
    n = 2 * b

    # Tiny (O(n)) side inputs only; the (n, D) feature concat happens in-kernel.
    labels = jnp.concatenate([label_wt, label_mt], axis=0).astype(jnp.float32)
    lab_col = labels.reshape(n, 1)
    lab_row = labels.reshape(1, n)
    sq_row = jnp.concatenate(
        [jnp.sum(wt_emb.astype(jnp.float32) ** 2, axis=1),
         jnp.sum(mt_emb.astype(jnp.float32) ** 2, axis=1)], axis=0).reshape(1, n)

    if ti is None:
        ti = 128 if n % 128 == 0 else (8 if n % 8 == 0 else n)
    if tk is None:
        tk = 128 if n % 128 == 0 else (8 if n % 8 == 0 else n)
    assert n % ti == 0 and n % tk == 0

    kernel = functools.partial(rnc_loss_kernel, n=n, nb=b, ti=ti, tk=tk,
                               temperature=float(temperature))

    cost = pl.CostEstimate(
        flops=int(2 * n * n * d + 3 * n ** 3 + 12 * n * n),
        transcendentals=int(3 * n * n),
        bytes_accessed=int(4 * (2 * b * d + 3 * n + 1)),
    )

    out = pl.pallas_call(
        kernel,
        out_shape=jax.ShapeDtypeStruct((1, 1), jnp.float32),
        grid_spec=pltpu.PrefetchScalarGridSpec(
            num_scalar_prefetch=0,
            grid=(n // ti,),
            in_specs=[
                pl.BlockSpec((b, d), lambda i: (0, 0)),   # wt_emb (keys, half 1)
                pl.BlockSpec((b, d), lambda i: (0, 0)),   # mt_emb (keys, half 2)
                pl.BlockSpec((n, 1), lambda i: (0, 0)),   # labels, column form
                pl.BlockSpec((1, n), lambda i: (0, 0)),   # labels, row form
                pl.BlockSpec((1, n), lambda i: (0, 0)),   # ||f_j||^2, row form
            ],
            out_specs=pl.BlockSpec(memory_space=pltpu.MemorySpace.SMEM),
            scratch_shapes=[
                pltpu.VMEM((n, d), jnp.float32),          # concatenated features
                pltpu.VMEM((1, 1), jnp.float32),          # loss accumulator
            ],
        ),
        compiler_params=pltpu.CompilerParams(
            dimension_semantics=("arbitrary",),           # sequential: scratch carries state
            vmem_limit_bytes=32 * 1024 * 1024,
        ),
        cost_estimate=cost,
    )(wt_emb, mt_emb, lab_col, lab_row, sq_row)
    return out[0, 0]


def rnc_loss_ref(wt_emb, mt_emb, label_wt, label_mt, t=2.0):
    """Pure-JAX replica of the PyTorch forward (for verification)."""
    features = jnp.concatenate([wt_emb, mt_emb], axis=0)
    labels = jnp.concatenate([label_wt, label_mt], axis=0)[:, None]
    label_diffs = jnp.abs(labels[:, None, :] - labels[None, :, :]).sum(-1)
    diffs = features[:, None, :] - features[None, :, :]
    logits = -jnp.sqrt(jnp.sum(diffs * diffs, axis=-1)) / t
    logits = logits - jnp.max(logits, axis=1, keepdims=True)
    exp_logits = jnp.exp(logits)
    n = logits.shape[0]
    off = np.where(~np.eye(n, dtype=bool))
    logits = logits[off].reshape(n, n - 1)
    exp_logits = exp_logits[off].reshape(n, n - 1)
    label_diffs = label_diffs[off].reshape(n, n - 1)
    loss = 0.0
    for k in range(n - 1):
        pos_logits = logits[:, k]
        pos_ld = label_diffs[:, k]
        neg_mask = (label_diffs >= pos_ld[:, None]).astype(jnp.float32)
        pos_log_probs = pos_logits - jnp.log((neg_mask * exp_logits).sum(-1))
        loss += -(pos_log_probs / (n * (n - 1))).sum()
    return loss


if __name__ == "__main__":
    key = jax.random.PRNGKey(0)
    k1, k2, k3, k4 = jax.random.split(key, 4)
    B, D = 8, 32                      # n = 2*B = 16 samples total
    wt_emb = jax.random.normal(k1, (B, D), dtype=jnp.float32)
    mt_emb = jax.random.normal(k2, (B, D), dtype=jnp.float32)
    label_wt = jax.random.normal(k3, (B,), dtype=jnp.float32)
    label_mt = jax.random.normal(k4, (B,), dtype=jnp.float32)

    # ti=8 / tk=8 exercise both the i-block grid and the k-block loop at n=16.
    out = rnc_loss(wt_emb, mt_emb, label_wt, label_mt, temperature=2.0, ti=8, tk=8)
    out = jax.block_until_ready(out)

    ref = rnc_loss_ref(wt_emb, mt_emb, label_wt, label_mt, t=2.0)
    assert np.allclose(np.asarray(out), np.asarray(ref), rtol=1e-4, atol=1e-4), (out, ref)

    print("KERNEL_OK")
</pallas_src>

<mosaic_0001>
module attributes {stable_mosaic.version = 11 : i64} {
  func.func @rnc_loss_kernel(%arg0: i32, %arg1: memref<8x32xf32, #tpu.memory_space<vmem>>, %arg2: memref<8x32xf32, #tpu.memory_space<vmem>>, %arg3: memref<16x1xf32, #tpu.memory_space<vmem>>, %arg4: memref<1x16xf32, #tpu.memory_space<vmem>>, %arg5: memref<1x16xf32, #tpu.memory_space<vmem>>, %arg6: memref<1x1xf32, #tpu.memory_space<smem>>, %arg7: memref<16x32xf32, #tpu.memory_space<vmem>>, %arg8: memref<1x1xf32, #tpu.memory_space<vmem>>) attributes {dimension_semantics = [#tpu.dimension_semantics<arbitrary>], iteration_bounds = array<i64: 2>, scalar_prefetch = 0 : i64, scratch_operands = 2 : i64, tpu.core_type = #tpu.core_type<tc>, window_params = [{pipeline_mode = #tpu.pipeline_mode<synchronous>, transform_indices = @transform_0, window_bounds = array<i64: 8, 32>}, {pipeline_mode = #tpu.pipeline_mode<synchronous>, transform_indices = @transform_1, window_bounds = array<i64: 8, 32>}, {pipeline_mode = #tpu.pipeline_mode<synchronous>, transform_indices = @transform_2, window_bounds = array<i64: 16, 1>}, {pipeline_mode = #tpu.pipeline_mode<synchronous>, transform_indices = @transform_3, window_bounds = array<i64: 1, 16>}, {pipeline_mode = #tpu.pipeline_mode<synchronous>, transform_indices = @transform_4, window_bounds = array<i64: 1, 16>}, {transform_indices = @transform_5, window_bounds = array<i64: 1, 1>}]} {
    %c0_i32 = arith.constant 0 : i32
    %0 = arith.cmpi eq, %arg0, %c0_i32 : i32
    %1 = arith.extui %0 : i1 to i32
    %c0_i32_0 = arith.constant 0 : i32
    %2 = arith.cmpi ne, %1, %c0_i32_0 : i32
    scf.if %2 {
      %c0_37 = arith.constant 0 : index
      %c0_38 = arith.constant 0 : index
      %109 = vector.load %arg1[%c0_37, %c0_38] : memref<8x32xf32, #tpu.memory_space<vmem>>, vector<8x32xf32>
      %c0_39 = arith.constant 0 : index
      %c0_40 = arith.constant 0 : index
      %110 = vector.load %arg7[%c0_39, %c0_40] : memref<16x32xf32, #tpu.memory_space<vmem>>, vector<8x32xf32>
      tpu.vector_store %arg7[%c0_39, %c0_40], %109 {strides = array<i32>} : memref<16x32xf32, #tpu.memory_space<vmem>>, vector<8x32xf32>,
      %c0_41 = arith.constant 0 : index
      %c0_42 = arith.constant 0 : index
      %111 = vector.load %arg2[%c0_41, %c0_42] : memref<8x32xf32, #tpu.memory_space<vmem>>, vector<8x32xf32>
      %c8 = arith.constant 8 : index
      %c0_43 = arith.constant 0 : index
      %112 = vector.load %arg7[%c8, %c0_43] : memref<16x32xf32, #tpu.memory_space<vmem>>, vector<8x32xf32>
      tpu.vector_store %arg7[%c8, %c0_43], %111 {strides = array<i32>} : memref<16x32xf32, #tpu.memory_space<vmem>>, vector<8x32xf32>,
      %cst_44 = arith.constant 0.000000e+00 : f32
      %113 = vector.broadcast %cst_44 : f32 to vector<1x1xf32>
      %c0_45 = arith.constant 0 : index
      %c0_46 = arith.constant 0 : index
      %114 = vector.load %arg8[%c0_45, %c0_46] : memref<1x1xf32, #tpu.memory_space<vmem>>, vector<1x1xf32>
      tpu.vector_store %arg8[%c0_45, %c0_46], %113 {strides = array<i32>} : memref<1x1xf32, #tpu.memory_space<vmem>>, vector<1x1xf32>,
    } else {
    }
    %c8_i32 = arith.constant 8 : i32
    %3 = arith.muli %arg0, %c8_i32 : i32
    %4 = tpu.assume_multiple %3, 8 : i32
    %5 = arith.index_cast %4 : i32 to index
    %c0 = arith.constant 0 : index
    %6 = vector.load %arg7[%5, %c0] : memref<16x32xf32, #tpu.memory_space<vmem>>, vector<8x32xf32>
    %c0_1 = arith.constant 0 : index
    %c0_2 = arith.constant 0 : index
    %7 = vector.load %arg7[%c0_1, %c0_2] : memref<16x32xf32, #tpu.memory_space<vmem>>, vector<16x32xf32>
    %cst = arith.constant dense<0.000000e+00> : vector<8x16xf32>
    %8 = tpu.matmul %6, %7, %cst {dimension_numbers = #tpu.dot_dimension_numbers<[1], [1], [0], [0], [0, 0, 1, 0], [], []>} : vector<8x32xf32>, vector<16x32xf32>, vector<8x16xf32> -> vector<8x16xf32>
    %9 = arith.mulf %6, %6 : vector<8x32xf32>
    %cst_3 = arith.constant dense<0.000000e+00> : vector<8xf32>
    %10 = vector.multi_reduction <add>, %9, %cst_3 [1] : vector<8x32xf32> to vector<8xf32>
    %11 = vector.shape_cast %10 : vector<8xf32> to vector<8x1xf32>
    %c0_4 = arith.constant 0 : index
    %c0_5 = arith.constant 0 : index
    %12 = vector.load %arg5[%c0_4, %c0_5] : memref<1x16xf32, #tpu.memory_space<vmem>>, vector<1x16xf32>
    %13 = tpu.iota {dimensions = array<i32: 0>} : vector<8x16xi32>
    %14 = vector.broadcast %4 : i32 to vector<8x16xi32>
    %15 = arith.addi %13, %14 : vector<8x16xi32>
    %16 = tpu.iota {dimensions = array<i32: 1>} : vector<8x16xi32>
    %17 = arith.cmpi eq, %15, %16 : vector<8x16xi32>
    %18 = vector.broadcast %11 : vector<8x1xf32> to vector<8x16xf32>
    %19 = vector.broadcast %12 : vector<1x16xf32> to vector<8x16xf32>
    %20 = arith.addf %18, %19 : vector<8x16xf32>
    %cst_6 = arith.constant 2.000000e+00 : f32
    %21 = vector.broadcast %cst_6 : f32 to vector<8x16xf32>
    %22 = arith.mulf %21, %8 : vector<8x16xf32>
    %23 = arith.subf %20, %22 : vector<8x16xf32>
    %cst_7 = arith.constant 0.000000e+00 : f32
    %24 = vector.broadcast %cst_7 : f32 to vector<8x16xf32>
    %25 = arith.maximumf %23, %24 : vector<8x16xf32>
    %cst_8 = arith.constant 0.000000e+00 : f32
    %26 = vector.broadcast %cst_8 : f32 to vector<8x16xf32>
    %27 = arith.select %17, %26, %25 : vector<8x16xi1>, vector<8x16xf32>
    %28 = math.sqrt %27 : vector<8x16xf32>
    %cst_9 = arith.constant 0.000000e+00 : f32
    %29 = vector.broadcast %cst_9 : f32 to vector<8x16xf32>
    %30 = arith.subf %29, %28 : vector<8x16xf32>
    %cst_10 = arith.constant 2.000000e+00 : f32
    %31 = vector.broadcast %cst_10 : f32 to vector<8x16xf32>
    %32 = arith.divf %30, %31 : vector<8x16xf32>
    %33 = math.exp %32 : vector<8x16xf32>
    %34 = arith.index_cast %4 : i32 to index
    %c0_11 = arith.constant 0 : index
    %35 = vector.load %arg3[%34, %c0_11] : memref<16x1xf32, #tpu.memory_space<vmem>>, vector<8x1xf32>
    %c0_12 = arith.constant 0 : index
    %c0_13 = arith.constant 0 : index
    %36 = vector.load %arg4[%c0_12, %c0_13] : memref<1x16xf32, #tpu.memory_space<vmem>>, vector<1x16xf32>
    %37 = vector.broadcast %35 : vector<8x1xf32> to vector<8x16xf32>
    %38 = vector.broadcast %36 : vector<1x16xf32> to vector<8x16xf32>
    %39 = arith.subf %37, %38 : vector<8x16xf32>
    %40 = math.absf %39 : vector<8x16xf32>
    %41 = vector.shape_cast %32 : vector<8x16xf32> to vector<1x8x16xf32>
    %cst_14 = arith.constant dense<0.000000e+00> : vector<1xf32>
    %42 = vector.multi_reduction <add>, %41, %cst_14 [1, 2] : vector<1x8x16xf32> to vector<1xf32>
    %43 = vector.shape_cast %42 : vector<1xf32> to vector<1x1x1xf32>
    %44 = vector.extract %43[0, 0, 0] : f32 from vector<1x1x1xf32>
    %45 = vector.extract_strided_slice %40 {offsets = [0, 0], sizes = [8, 8], strides = [1, 1]} : vector<8x16xf32> to vector<8x8xf32>
    %46 = vector.shape_cast %40 : vector<8x16xf32> to vector<8x1x16xf32>
    %47 = vector.shape_cast %45 : vector<8x8xf32> to vector<8x8x1xf32>
    %48 = vector.broadcast %46 : vector<8x1x16xf32> to vector<8x8x16xf32>
    %49 = vector.broadcast %47 : vector<8x8x1xf32> to vector<8x8x16xf32>
    %50 = arith.cmpf oge, %48, %49 : vector<8x8x16xf32>
    %51 = vector.shape_cast %33 : vector<8x16xf32> to vector<8x1x16xf32>
    %cst_15 = arith.constant 0.000000e+00 : f32
    %52 = vector.shape_cast %51 : vector<8x1x16xf32> to vector<8x1x16xf32>
    %53 = vector.broadcast %52 : vector<8x1x16xf32> to vector<8x8x16xf32>
    %54 = vector.broadcast %cst_15 : f32 to vector<8x8x16xf32>
    %55 = arith.select %50, %53, %54 : vector<8x8x16xi1>, vector<8x8x16xf32>
    %cst_16 = arith.constant dense<0.000000e+00> : vector<8x8xf32>
    %56 = vector.multi_reduction <add>, %55, %cst_16 [2] : vector<8x8x16xf32> to vector<8x8xf32>
    %cst_17 = arith.constant 0.000000e+00 : f32
    %57 = vector.broadcast %cst_17 : f32 to vector<8x8xf32>
    %58 = arith.cmpf oeq, %45, %57 : vector<8x8xf32>
    %cst_18 = arith.constant 1.000000e+00 : f32
    %cst_19 = arith.constant 0.000000e+00 : f32
    %59 = vector.broadcast %cst_18 : f32 to vector<8x8xf32>
    %60 = vector.broadcast %cst_19 : f32 to vector<8x8xf32>
    %61 = arith.select %58, %59, %60 : vector<8x8xi1>, vector<8x8xf32>
    %62 = arith.subf %56, %61 : vector<8x8xf32>
    %63 = vector.extract_strided_slice %17 {offsets = [0, 0], sizes = [8, 8], strides = [1, 1]} : vector<8x16xi1> to vector<8x8xi1>
    %cst_20 = arith.constant dense<true> : vector<8x8xi1>
    %64 = arith.xori %63, %cst_20 : vector<8x8xi1>
    %65 = math.log %62 : vector<8x8xf32>
    %cst_21 = arith.constant 0.000000e+00 : f32
    %66 = vector.broadcast %cst_21 : f32 to vector<8x8xf32>
    %67 = arith.select %64, %65, %66 : vector<8x8xi1>, vector<8x8xf32>
    %68 = vector.shape_cast %67 : vector<8x8xf32> to vector<1x8x8xf32>
    %cst_22 = arith.constant dense<0.000000e+00> : vector<1xf32>
    %69 = vector.multi_reduction <add>, %68, %cst_22 [1, 2] : vector<1x8x8xf32> to vector<1xf32>
    %70 = vector.shape_cast %69 : vector<1xf32> to vector<1x1x1xf32>
    %71 = vector.extract %70[0, 0, 0] : f32 from vector<1x1x1xf32>
    %cst_23 = arith.constant 0.000000e+00 : f32
    %72 = arith.addf %cst_23, %71 : f32
    %73 = vector.extract_strided_slice %40 {offsets = [0, 8], sizes = [8, 8], strides = [1, 1]} : vector<8x16xf32> to vector<8x8xf32>
    %74 = vector.shape_cast %40 : vector<8x16xf32> to vector<8x1x16xf32>
    %75 = vector.shape_cast %73 : vector<8x8xf32> to vector<8x8x1xf32>
    %76 = vector.broadcast %74 : vector<8x1x16xf32> to vector<8x8x16xf32>
    %77 = vector.broadcast %75 : vector<8x8x1xf32> to vector<8x8x16xf32>
    %78 = arith.cmpf oge, %76, %77 : vector<8x8x16xf32>
    %79 = vector.shape_cast %33 : vector<8x16xf32> to vector<8x1x16xf32>
    %cst_24 = arith.constant 0.000000e+00 : f32
    %80 = vector.shape_cast %79 : vector<8x1x16xf32> to vector<8x1x16xf32>
    %81 = vector.broadcast %80 : vector<8x1x16xf32> to vector<8x8x16xf32>
    %82 = vector.broadcast %cst_24 : f32 to vector<8x8x16xf32>
    %83 = arith.select %78, %81, %82 : vector<8x8x16xi1>, vector<8x8x16xf32>
    %cst_25 = arith.constant dense<0.000000e+00> : vector<8x8xf32>
    %84 = vector.multi_reduction <add>, %83, %cst_25 [2] : vector<8x8x16xf32> to vector<8x8xf32>
    %cst_26 = arith.constant 0.000000e+00 : f32
    %85 = vector.broadcast %cst_26 : f32 to vector<8x8xf32>
    %86 = arith.cmpf oeq, %73, %85 : vector<8x8xf32>
    %cst_27 = arith.constant 1.000000e+00 : f32
    %cst_28 = arith.constant 0.000000e+00 : f32
    %87 = vector.broadcast %cst_27 : f32 to vector<8x8xf32>
    %88 = vector.broadcast %cst_28 : f32 to vector<8x8xf32>
    %89 = arith.select %86, %87, %88 : vector<8x8xi1>, vector<8x8xf32>
    %90 = arith.subf %84, %89 : vector<8x8xf32>
    %91 = vector.extract_strided_slice %17 {offsets = [0, 8], sizes = [8, 8], strides = [1, 1]} : vector<8x16xi1> to vector<8x8xi1>
    %cst_29 = arith.constant dense<true> : vector<8x8xi1>
    %92 = arith.xori %91, %cst_29 : vector<8x8xi1>
    %93 = math.log %90 : vector<8x8xf32>
    %cst_30 = arith.constant 0.000000e+00 : f32
    %94 = vector.broadcast %cst_30 : f32 to vector<8x8xf32>
    %95 = arith.select %92, %93, %94 : vector<8x8xi1>, vector<8x8xf32>
    %96 = vector.shape_cast %95 : vector<8x8xf32> to vector<1x8x8xf32>
    %cst_31 = arith.constant dense<0.000000e+00> : vector<1xf32>
    %97 = vector.multi_reduction <add>, %96, %cst_31 [1, 2] : vector<1x8x8xf32> to vector<1xf32>
    %98 = vector.shape_cast %97 : vector<1xf32> to vector<1x1x1xf32>
    %99 = vector.extract %98[0, 0, 0] : f32 from vector<1x1x1xf32>
    %100 = arith.addf %72, %99 : f32
    %c0_32 = arith.constant 0 : index
    %c0_33 = arith.constant 0 : index
    %101 = vector.load %arg8[%c0_32, %c0_33] : memref<1x1xf32, #tpu.memory_space<vmem>>, vector<1x1xf32>
    %102 = arith.subf %44, %100 : f32
    %103 = vector.broadcast %102 : f32 to vector<1x1xf32>
    %104 = arith.addf %101, %103 : vector<1x1xf32>
    %c0_34 = arith.constant 0 : index
    %c0_35 = arith.constant 0 : index
    %105 = vector.load %arg8[%c0_34, %c0_35] : memref<1x1xf32, #tpu.memory_space<vmem>>, vector<1x1xf32>
    tpu.vector_store %arg8[%c0_34, %c0_35], %104 {strides = array<i32>} : memref<1x1xf32, #tpu.memory_space<vmem>>, vector<1x1xf32>,
    %c1_i32 = arith.constant 1 : i32
    %106 = arith.cmpi eq, %arg0, %c1_i32 : i32
    %107 = arith.extui %106 : i1 to i32
    %c0_i32_36 = arith.constant 0 : i32
    %108 = arith.cmpi ne, %107, %c0_i32_36 : i32
    scf.if %108 {
      %c0_37 = arith.constant 0 : index
      %c0_38 = arith.constant 0 : index
      %109 = vector.load %arg8[%c0_37, %c0_38] : memref<1x1xf32, #tpu.memory_space<vmem>>, vector<1x1xf32>
      %110 = vector.shape_cast %109 : vector<1x1xf32> to vector<1x1x1xf32>
      %cst_39 = arith.constant dense<0.000000e+00> : vector<1xf32>
      %111 = vector.multi_reduction <add>, %110, %cst_39 [1, 2] : vector<1x1x1xf32> to vector<1xf32>
      %112 = vector.shape_cast %111 : vector<1xf32> to vector<1x1x1xf32>
      %113 = vector.extract %112[0, 0, 0] : f32 from vector<1x1x1xf32>
      %cst_40 = arith.constant 0.000000e+00 : f32
      %114 = arith.subf %cst_40, %113 : f32
      %cst_41 = arith.constant 2.400000e+02 : f32
      %115 = arith.divf %114, %cst_41 : f32
      %c0_42 = arith.constant 0 : index
      %c0_43 = arith.constant 0 : index
      %116 = memref.load %arg6[%c0_42, %c0_43] : memref<1x1xf32, #tpu.memory_space<smem>>
      memref.store %115, %arg6[%c0_42, %c0_43] : memref<1x1xf32, #tpu.memory_space<smem>>
    } else {
    }
    return
  }
  func.func @transform_0(%arg0: i32) -> (i32, i32) {
    %c0_i32 = arith.constant 0 : i32
    %c0_i32_0 = arith.constant 0 : i32
    %c0_i32_1 = arith.constant 0 : i32
    return %c0_i32, %c0_i32_0 : i32, i32
  }
  func.func @transform_1(%arg0: i32) -> (i32, i32) {
    %c0_i32 = arith.constant 0 : i32
    %c0_i32_0 = arith.constant 0 : i32
    %c0_i32_1 = arith.constant 0 : i32
    return %c0_i32, %c0_i32_0 : i32, i32
  }
  func.func @transform_2(%arg0: i32) -> (i32, i32) {
    %c0_i32 = arith.constant 0 : i32
    %c0_i32_0 = arith.constant 0 : i32
    %c0_i32_1 = arith.constant 0 : i32
    return %c0_i32, %c0_i32_0 : i32, i32
  }
  func.func @transform_3(%arg0: i32) -> (i32, i32) {
    %c0_i32 = arith.constant 0 : i32
    %c0_i32_0 = arith.constant 0 : i32
    %c0_i32_1 = arith.constant 0 : i32
    return %c0_i32, %c0_i32_0 : i32, i32
  }
  func.func @transform_4(%arg0: i32) -> (i32, i32) {
    %c0_i32 = arith.constant 0 : i32
    %c0_i32_0 = arith.constant 0 : i32
    %c0_i32_1 = arith.constant 0 : i32
    return %c0_i32, %c0_i32_0 : i32, i32
  }
  func.func @transform_5(%arg0: i32) -> (i32, i32) {
    %c0_i32 = arith.constant 0 : i32
    %c0_i32_0 = arith.constant 0 : i32
    %c0_i32_1 = arith.constant 0 : i32
    return %c0_i32, %c0_i32_0 : i32, i32
  }
}

</mosaic_0001>

<bundles_post_ra>
// kernel: tpu_custom_call.1
= control target key start
LH: loop header
LB: loop body
LE: loop exit
PB: predicated region body
PF: predicated region fallthrough
CT: control target
= control target key end

     0   :  { %10 = vsyncpa [#allocation5], 0  ;;  %s1110_s18 = smov 0   ;;  %s1341_s0 = inlined_call_operand.vmem [shape: f32[8,32], index: 0, kind: input, shape index: {}]   ;;  %s1342_s1 = inlined_call_operand.vmem [shape: f32[8,32], index: 1, kind: input, shape index: {}]   ;;  %s1343_s2 = inlined_call_operand.vmem [shape: f32[16,1], index: 2, kind: input, shape index: {}]   ;;  %s1344_s3 = inlined_call_operand.vmem [shape: f32[1,16], index: 3, kind: input, shape index: {}]   ;;  %s1345_s4 = inlined_call_operand.vmem [shape: f32[1,16], index: 4, kind: input, shape index: {}]   ;;  %s1346_s5 = inlined_call_operand.hbm [shape: f32[1,1], index: 5, kind: output, shape index: {}]  }
   0x1 LB: > { %s1116_s19 = sadd.s32 4294967295, %s1070_s18   ;;  %p907_p0 = scmp.ge.s32.totalorder %s1070_s18, 1  ;;  %s1070_s18 = sphi %s1110_s18, %s16_s18  }
   0x2   : > { %p173_p1 = scmp.lt.s32.totalorder %s1070_s18, 3 }
   0x4   : > { %p174_p2 = pnand %p907_p0, %p173_p1 }
   0x5   : > { %p908_p3 = scmp.ne.s32.totalorder (!%p174_p2), %s1116_s19, 0 }
   0x6   : > { %177 = sbr.rel (%p174_p2) target bundleno = 987 (0x3db), region = 40 }
   0xb   : > { %194 = sbr.rel (%p908_p3) target bundleno = 20 (0x14), region = 44 }
  0x10   : > { %v195_v0 = vld [vmem:[%s1341_s0] sm:$0xff]  ;;  %vm196_vm0 = vcmask 261120   ;;  %vm200_vm1 = vcmask 0   ;;  %v1072_v2 = vmov 0.0  }
  0x11   : > { %v198_v1 = vld [vmem:[%s1342_s1] sm:$0xff]  ;;  %197 = vst.msk [vmem:[#allocation2] sm:$0xff] %vm196_vm0, %v195_v0 }
  0x12   : > { %199 = vst.msk [vmem:[#allocation2 + $0x8] sm:$0xff] %vm196_vm0, %v198_v1 }
  0x13   : > { %201 = vst.msk [vmem:[#allocation3] sm:$0x1] %vm200_vm1, %v1072_v2 }
  0x14 PF: > { %vm207_vm2 = vcmask 261120   ;;  %s1128_s24 = sshll.u32 %s1116_s19, 3  ;;  %v1073_v4 = vmov 0   ;;  %v242_v10 = vlaneseq  ;;  %v1005_v14 = vld [vmem:[%s1344_s3] ss:$0 sm:$0xff]  ;;  %v1074_v21 = vmov 0.0  }
  0x15   : > { %950 = vset.pattern.permute.xlu0 %v1073_v4  ;;  %s203_s25 = scalar_lea.vmem [#allocation2], %s1128_s24  ;;  %s280_s28 = scalar_lea.vmem %s1343_s2, %s1128_s24  ;;  %v1004_v29 = vld [vmem:[%s1345_s4] ss:$0 sm:$0xff]  ;;  %v244_v31 = vstv %s1128_s24  ;;  %v1075_v44 = vmov 2.0   ;;  %vm293_vm9 = vcmask 130048  }
  0x16   : > { %v281_v9 = vld [vmem:[%s280_s28] sm:$0xff]  ;;  %v1136_v11 = vshrl.u32 %v242_v10, 7  ;;  %v1173_v36 = vand.u32 127, %v242_v10  ;;  %s1077_s8 = smov 120   ;;  %p913_p4 = scmp.ne.s32.totalorder %s1116_s19, 1 }
  0x18   : > { %v205_v5 = vld [vmem:[#allocation2] sm:$0xff]  ;;  %952 = vset.pattern.permute.xlu2 %v1136_v11  ;;  %951 = vset.pattern.permute.xlu1 %v1136_v11  ;;  %v1141_v12 = vadd.s32 8, %v1136_v11  ;;  %v1171_v35 = vadd.s32 %v244_v31, %v1136_v11 }
  0x19   : > { %v206_v3 = vld [vmem:[#allocation2 + $0x8] sm:$0xff]  ;;  %v204_v6 = vld [vmem:[%s203_s25] sm:$0xff] }
  0x1a   : > { %910 = vmatpush.xpose.msk.msra.mxu0 %vm207_vm2, %v206_v3  ;;  %v237_v7 = vmul.f32 %v204_v6, %v204_v6  ;;  %vm248_vm4 = vcmp.eq.s32.totalorder %v1171_v35, %v1173_v36 }
  0x1c   : > { %v238_v8 = vsel %vm207_vm2, %v237_v7, 0.0 }
  0x1d   : > { %239 = vadd.xlane.f32.xlu0 %v238_v8 }
  0x1e   : > { %911 = vmatpush.xpose.msk.msra.mxu0 %vm207_vm2, %v205_v5 }
  0x21   : > { %912 = vmatmul.msk.f32.vlgmr.msra.gmra.mxu0 %vm207_vm2, %v204_v6 }
  0x31   : > { %285 = vperm.xlu0 %950, %v281_v9  }
  0x39   : > { %955 = vset.pattern.permute.xlu0 %v1141_v12 }
  0x90   : > { %v240_v13 = vpop.xlane.xlu0 %239 }
  0x91   : > { %v252_v32 = vadd.f32 %v1004_v29, %v240_v13 }
  0x9e   : > { %v234_v28 = vpop.f32.mrf.mxu0 }
  0x9f   : > { %v253_v30 = vmul.f32 2.0, %v234_v28 }
  0xa1   : > { %v254_v34 = vsub.f32 %v252_v32, %v253_v30 }
  0xa3   : > { %v286_v15 = vpop.permute.xlu0 %285  ;;  %v255_v37 = vmax.f32 %v254_v34, 0.0 }
  0xa4   : > { %v291_v16 = vsub.f32 %v286_v15, %v1005_v14 }
  0xa5   : > { %v256_v38 = vsel %vm248_vm4, 0.0, %v255_v37 }
  0xa6   : > { %v1147_v17 = vand.u32 2147483647, %v291_v16  ;;  %1006 = vrsqrt.f32 %v256_v38  ;;  %vm264_vm5 = vcmp.eq.f32.partialorder %v256_v38, inf  ;;  %v267_v56 = vand.u32 2147483648, %v256_v38 }
  0xa7   : > { %1008 = vrcp.f32 %v1075_v44  ;;  %vm266_vm6 = vcmp.eq.f32.partialorder %v256_v38, 0.0 }
  0xa8   : > { %v340_v18 = vperm.slane %v1147_v17, 4  ;;  %v319_v19 = vperm.slane %v1147_v17, 1  ;;  %v1152_v20 = vperm.slane %v1147_v17, 0  ;;  %vm448_vm3 = vcmp.eq.f32.partialorder %v1147_v17, 0.0 }
  0xa9   : > { %v1155_v22 = vsel %vm448_vm3, 1.0, %v1074_v21  ;;  %v326_v26 = vperm.slane %v1147_v17, 2  ;;  %v354_v27 = vperm.slane %v1147_v17, 6  ;;  %v333_v33 = vperm.slane %v1147_v17, 3 }
  0xaa   : > { %636 = vperm.xlu0 %955, %v340_v18   ;;  %324 = vperm.xlu2 %952, %v319_v19   ;;  %v451_v23 = vperm.slane %v1155_v22, 0  ;;  %v458_v24 = vperm.slane %v1155_v22, 1  ;;  %v347_v39 = vperm.slane %v1147_v17, 5  ;;  %v361_v42 = vperm.slane %v1147_v17, 7 }
  0xab   : > { %317 = vperm.xlu1 %951, %v1152_v20   ;;  %v465_v54 = vperm.slane %v1155_v22, 2  ;;  %v472_v55 = vperm.slane %v1155_v22, 3  ;;  %v479_v0 = vperm.slane %v1155_v22, 4  ;;  %v486_v1 = vperm.slane %v1155_v22, 5 }
  0xac   : > { %v1160_v25 = vpack.i.bf16 %v458_v24, %v451_v23  ;;  %v1007_v40 = vpop.eup %1006  ;;  %v305_v3 = vrot.slane %v1147_v17, 1  ;;  %v306_v13 = vrot.slane %v1147_v17, 2  ;;  %v308_v23 = vrot.slane %v1147_v17, 4 }
  0xad   : > { %v258_v41 = vmul.f32 %v1007_v40, %v256_v38  ;;  %v1009_v46 = vpop.eup %1008  ;;  %v963_v59 = vpack.i.bf16 %v472_v55, %v465_v54  ;;  %v969_v5 = vpack.i.bf16 %v486_v1, %v479_v0  ;;  %v309_v31 = vrot.slane %v1147_v17, 5 }
  0xae   : > { %v271_v48 = vmul.f32 2.0, %v1009_v46  ;;  %vm275_vm7 = vweird.f32 %v1009_v46  ;;  %v1197_v7 = vperm.slane %v305_v3, 0  ;;  %v1208_v15 = vperm.slane %v306_v13, 0 }
  0xaf   : > { %v259_v43 = vmul.f32 %v1007_v40, %v258_v41  ;;  %v311_v41 = vrot.slane %v1147_v17, 7  ;;  %v310_v55 = vrot.slane %v1147_v17, 6 }
  0xb0   : > { %v272_v50 = vsub.f32 1.0, %v271_v48 }
  0xb1   : > { %v260_v45 = vmul.f32 0.5, %v259_v43  ;;  %v307_v43 = vrot.slane %v1147_v17, 3 }
  0xb2   : > { %956 = vset.pattern.permute.xlu0 %v1136_v11  ;;  %331 = vperm.xlu2 %952, %v326_v26   ;;  %v273_v52 = vmul.f32 %v1009_v46, %v272_v50 }
  0xb3   : > { %359 = vperm.xlu1 %951, %v354_v27   ;;  %v261_v47 = vsub.f32 1.5, %v260_v45  ;;  %v371_v48 = vperm.slane %v307_v43, 0 }
  0xb4   : > { %v274_v58 = vadd.f32 %v1009_v46, %v273_v52 }
  0xb5   : > { %v262_v49 = vmul.f32 %v1007_v40, %v261_v47 }
  0xb6   : > { %v276_v61 = vsel %vm275_vm7, %v1009_v46, %v274_v58  ;;  %v375_v46 = vperm.slane %v311_v41, 0  ;;  %v374_v58 = vperm.slane %v310_v55, 0 }
  0xb7   : > { %v263_v51 = vmul.f32 %v262_v49, %v256_v38 }
  0xb9   : > { %v265_v53 = vsel %vm264_vm5, %v256_v38, %v263_v51 }
  0xba   : > { %958 = vperm.xlu0 %956, %v1160_v25   ;;  %338 = vperm.xlu2 %952, %v333_v33   ;;  %v268_v57 = vsel %vm266_vm6, %v267_v56, %v265_v53 }
  0xbb   : > { %953 = vset.pattern.permute.xlu1 %v1141_v12  ;;  %v269_v60 = vsub.f32 0.0, %v268_v57 }
  0xbd   : > { %v277_v62 = vmul.f32 %v276_v61, %v269_v60 }
  0xbf   : > { %v278_v63 = vmul.f32 1.442695, %v277_v62  ;;  %v294_v37 = vsel %vm293_vm9, %v277_v62, 0.0 }
  0xc1   : > { %1010 = vpow2.f32 %v278_v63 }
  0xc2   : > { %345 = vperm.xlu2 %952, %v340_v18  }
  0xc3   : > { %612 = vperm.xlu1 %953, %v1152_v20  }
  0xc7   : > { %v1193_v2 = vpop.eup %1010 }
  0xc8   : > { %v393_v6 = vrot.slane %v1193_v2, 1  ;;  %v394_v14 = vrot.slane %v1193_v2, 2  ;;  %v396_v24 = vrot.slane %v1193_v2, 4  ;;  %v397_v32 = vrot.slane %v1193_v2, 5 }
  0xc9   : > { %v399_v44 = vrot.slane %v1193_v2, 7  ;;  %v395_v47 = vrot.slane %v1193_v2, 3  ;;  %v398_v57 = vrot.slane %v1193_v2, 6 }
  0xca   : > { %352 = vperm.xlu2 %952, %v347_v39   ;;  %v1200_v9 = vperm.slane %v393_v6, 0  ;;  %v1210_v18 = vperm.slane %v394_v14, 0  ;;  %v404_v28 = vperm.slane %v396_v24, 0  ;;  %v1226_v38 = vperm.slane %v397_v32, 0 }
  0xcb   : > { %624 = vperm.xlu1 %953, %v326_v26   ;;  %v372_v26 = vperm.slane %v308_v23, 0  ;;  %v407_v51 = vperm.slane %v399_v44, 0  ;;  %v403_v54 = vperm.slane %v395_v47, 0  ;;  %v406_v61 = vperm.slane %v398_v57, 0 }
  0xd2   : > { %366 = vperm.xlu2 %952, %v361_v42  }
  0xd3   : > { %642 = vperm.xlu1 %953, %v347_v39  }
  0xda   : > { %954 = vset.pattern.permute.xlu2 %v1141_v12 }
  0xdb   : > { %654 = vperm.xlu1 %953, %v361_v42   ;;  %v400_v42 = vperm.slane %v1193_v2, 0 }
  0xe2   : > { %618 = vperm.xlu2 %954, %v319_v19  }
  0xe3   : > { %962 = vset.pattern.permute.xlu1 %v1136_v11 }
  0xea   : > { %630 = vperm.xlu2 %954, %v333_v33   ;;  %v1223_v33 = vperm.slane %v309_v31, 0 }
  0xeb   : > { %964 = vperm.xlu1 %962, %v963_v59  }
  0xf2   : > { %648 = vperm.xlu2 %954, %v354_v27  }
  0xf3   : > { %980 = vset.pattern.permute.xlu1 %v1141_v12 }
  0xfa   : > { %968 = vset.pattern.permute.xlu2 %v1136_v11 }
  0xfb   : > { %982 = vperm.xlu1 %980, %v963_v59  }
 0x102   : > { %970 = vperm.xlu2 %968, %v969_v5  }
 0x103   : > { %1002 = vset.pattern.permute.xlu1 %v1073_v4 }
 0x104   : > { %v325_v8 = vpop.permute.xlu2 %324 }
 0x105   : > { %vm385_vm8 = vcmp.ge.f32.partialorder %v1197_v7, %v325_v8 }
 0x106   : > { %v417_v10 = vsel %vm385_vm8, %v1200_v9, 0.0 }
 0x107   : > { %v427_v11 = vsel %vm293_vm9, %v417_v10, 0.0 }
 0x108   : > { %428 = vadd.xlane.f32.xlu0 %v427_v11 }
 0x10a   : > { %974 = vset.pattern.permute.xlu2 %v1141_v12 }
 0x10c   : > { %v332_v16 = vpop.permute.xlu2 %331 }
 0x10d   : > { %vm386_vm10 = vcmp.ge.f32.partialorder %v1208_v15, %v332_v16 }
 0x10e   : > { %v1214_v19 = vsel %vm386_vm10, %v1210_v18, 0.0 }
 0x10f   : > { %v430_v6 = vsel %vm293_vm9, %v1214_v19, 0.0 }
 0x112   : > { %976 = vperm.xlu2 %974, %v1160_v25  }
 0x114   : > { %v339_v21 = vpop.permute.xlu2 %338 }
 0x115   : > { %vm387_vm0 = vcmp.ge.f32.partialorder %v371_v48, %v339_v21 }
 0x116   : > { %v419_v56 = vsel %vm387_vm0, %v403_v54, 0.0  ;;  %vm592_vm0 = vcmask 1047559  }
 0x117   : > { %v433_v59 = vsel %vm293_vm9, %v419_v56, 0.0 }
 0x11a   : > { %987 = vperm.xlu2 %974, %v969_v5  }
 0x11c   : > { %v637_v12 = vpop.permute.xlu0 %636  ;;  %v346_v27 = vpop.permute.xlu2 %345 }
 0x11d   : > { %vm660_vm11 = vcmp.ge.f32.partialorder %v372_v26, %v637_v12  ;;  %vm388_vm12 = vcmp.ge.f32.partialorder %v372_v26, %v346_v27  ;;  %v318_v25 = vpop.permute.xlu1 %317 }
 0x11e   : > { %v420_v29 = vsel %vm388_vm12, %v404_v28, 0.0  ;;  %v1219_v30 = vsel %vm660_vm11, %v404_v28, 0.0  ;;  %vm384_vm14 = vcmp.ge.f32.partialorder %v1152_v20, %v318_v25  ;;  %vm582_vm11 = vcmask 1042434  }
 0x11f   : > { %v416_v45 = vsel %vm384_vm14, %v400_v42, 0.0  ;;  %v684_v16 = vsel %vm293_vm9, %v1219_v30, 0.0  ;;  %vm584_vm12 = vcmask 1043459   ;;  %vm588_vm14 = vcmask 1045509  }
 0x120   : > { %v424_v50 = vsel %vm293_vm9, %v416_v45, 0.0 }
 0x124   : > { %v353_v34 = vpop.permute.xlu2 %352 }
 0x125   : > { %vm389_vm13 = vcmp.ge.f32.partialorder %v1223_v33, %v353_v34  ;;  %295 = vadd.xlane.f32.xlu1 %v294_v37  ;;  %v360_v52 = vpop.permute.xlu1 %359 }
 0x126   : > { %v421_v39 = vsel %vm389_vm13, %v1226_v38, 0.0  ;;  %vm390_vm1 = vcmp.ge.f32.partialorder %v374_v58, %v360_v52  ;;  %vm586_vm13 = vcmask 1044484  }
 0x127   : > { %v439_v40 = vsel %vm293_vm9, %v421_v39, 0.0  ;;  %v422_v62 = vsel %vm390_vm1, %v406_v61, 0.0  ;;  %vm1076_vm1 = vmmov 1  }
 0x128   : > { %440 = vadd.xlane.f32.xlu0 %v439_v40  ;;  %v442_v0 = vsel %vm293_vm9, %v422_v62, 0.0 }
 0x12c   : > { %v367_v49 = vpop.permute.xlu2 %366 }
 0x12d   : > { %vm391_vm15 = vcmp.ge.f32.partialorder %v375_v46, %v367_v49  ;;  %425 = vadd.xlane.f32.xlu1 %v424_v50 }
 0x12e   : > { %v423_v53 = vsel %vm391_vm15, %v407_v51, 0.0  ;;  %vm590_vm15 = vcmask 1046534  }
 0x12f   : > { %v445_v19 = vsel %vm293_vm9, %v423_v53, 0.0 }
 0x135   : > { %v613_v60 = vpop.permute.xlu1 %612  ;;  %434 = vadd.xlane.f32.xlu1 %v433_v59 }
 0x136   : > { %vm656_vm8 = vcmp.ge.f32.partialorder %v1152_v20, %v613_v60  ;;  %v500_v20 = vperm.slane %v1155_v22, 7 }
 0x137   : > { %v664_v26 = vsel %vm656_vm8, %v400_v42, 0.0 }
 0x138   : > { %v672_v12 = vsel %vm293_vm9, %v664_v26, 0.0 }
 0x13c   : > { %v619_v63 = vpop.permute.xlu2 %618 }
 0x13d   : > { %vm657_vm2 = vcmp.ge.f32.partialorder %v1197_v7, %v619_v63  ;;  %v625_v1 = vpop.permute.xlu1 %624  ;;  %443 = vadd.xlane.f32.xlu1 %v442_v0 }
 0x13e   : > { %vm658_vm3 = vcmp.ge.f32.partialorder %v1208_v15, %v625_v1  ;;  %v665_v17 = vsel %vm657_vm2, %v1200_v9, 0.0  ;;  %v436_v9 = vsel %vm293_vm9, %v420_v29, 0.0  ;;  %v493_v29 = vperm.slane %v1155_v22, 6  ;;  %vm1308_vm2 = vmxor %vm248_vm4, %vm1076_vm1 }
 0x13f   : > { %v675_v3 = vsel %vm293_vm9, %v665_v17, 0.0  ;;  %v666_v5 = vsel %vm658_vm3, %v1210_v18, 0.0  ;;  %vm596_vm4 = vcmask 64512   ;;  %vm845_vm3 = vcmask 0  }
 0x140   : > { %676 = vadd.xlane.f32.xlu0 %v675_v3  ;;  %v678_v10 = vsel %vm293_vm9, %v666_v5, 0.0  ;;  %v991_v30 = vpack.i.bf16 %v500_v20, %v493_v29 }
 0x143   : > { %431 = vadd.xlane.f32.xlu2 %v430_v6 }
 0x144   : > { %v631_v8 = vpop.permute.xlu2 %630 }
 0x145   : > { %vm659_vm5 = vcmp.ge.f32.partialorder %v371_v48, %v631_v8  ;;  %v643_v7 = vpop.permute.xlu1 %642  ;;  %679 = vadd.xlane.f32.xlu1 %v678_v10 }
 0x146   : > { %v667_v11 = vsel %vm659_vm5, %v403_v54, 0.0  ;;  %vm661_vm7 = vcmp.ge.f32.partialorder %v1223_v33, %v643_v7  ;;  %v1274_v33 = vpop.permute.xlu0 %958 }
 0x147   : > { %v681_v13 = vsel %vm293_vm9, %v667_v11, 0.0  ;;  %v669_v21 = vsel %vm661_vm7, %v1226_v38, 0.0 }
 0x148   : > { %682 = vadd.xlane.f32.xlu0 %v681_v13  ;;  %v687_v24 = vsel %vm293_vm9, %v669_v21, 0.0 }
 0x14b   : > { %437 = vadd.xlane.f32.xlu2 %v436_v9 }
 0x14c   : > { %v649_v23 = vpop.permute.xlu2 %648 }
 0x14d   : > { %v655_v14 = vpop.permute.xlu1 %654  ;;  %vm662_vm10 = vcmp.ge.f32.partialorder %v374_v58, %v649_v23 }
 0x14e   : > { %vm663_vm6 = vcmp.ge.f32.partialorder %v375_v46, %v655_v14  ;;  %v670_v27 = vsel %vm662_vm10, %v406_v61, 0.0 }
 0x14f   : > { %v671_v15 = vsel %vm663_vm6, %v407_v51, 0.0  ;;  %v690_v28 = vsel %vm293_vm9, %v670_v27, 0.0 }
 0x150   : > { %v693_v18 = vsel %vm293_vm9, %v671_v15, 0.0  ;;  %685 = vadd.xlane.f32.xlu0 %v684_v16  ;;  %vm580_vm9 = vcmask 1041409  }
 0x151   : > { %694 = vadd.xlane.f32.xlu1 %v693_v18  ;;  %v961_v18 = vunpack.i.h.bf16 %v1274_v33 }
 0x153   : > { %446 = vadd.xlane.f32.xlu2 %v445_v19 }
 0x158   : > { %688 = vadd.xlane.f32.xlu0 %v687_v24 }
 0x15b   : > { %673 = vadd.xlane.f32.xlu2 %v672_v12 }
 0x15c   : > { %v1276_v37 = vpop.permute.xlu2 %970 }
 0x15d   : > { %v1270_v2 = vpop.permute.xlu1 %964  ;;  %v973_v60 = vunpack.i.h.bf16 %v1276_v37  ;;  %v972_v29 = vunpack.i.l.bf16 %v1276_v37 }
 0x15e   : > { %v966_v53 = vunpack.i.l.bf16 %v1270_v2 }
 0x160   : > { %691 = vadd.xlane.f32.xlu0 %v690_v28 }
 0x16c   : > { %v977_v42 = vpop.permute.xlu2 %976 }
 0x16d   : > { %v1272_v31 = vpop.permute.xlu1 %982  ;;  %v978_v57 = vunpack.i.l.bf16 %v977_v42  ;;  %v979_v1 = vunpack.i.h.bf16 %v977_v42 }
 0x16e   : > { %v984_v9 = vunpack.i.l.bf16 %v1272_v31  ;;  %v985_v26 = vunpack.i.h.bf16 %v1272_v31 }
 0x173   : > { %992 = vperm.xlu2 %974, %v991_v30  }
 0x174   : > { %997 = vperm.xlu0 %956, %v991_v30  }
 0x17b   : > { %1001 = vset.pattern.permute.xlu2 %v1073_v4  ;;  %v429_v40 = vpop.xlane.xlu0 %428 }
 0x17c   : > { %1003 = vset.pattern.permute.xlu0 %v1073_v4  ;;  %v1278_v4 = vpop.permute.xlu2 %987  ;;  %v516_v23 = vsub.f32 %v429_v40, %v961_v18 }
 0x17d   : > { %v989_v49 = vunpack.i.l.bf16 %v1278_v4 }
 0x198   : > { %v296_v32 = vpop.xlane.xlu1 %295 }
 0x199   : > { %v297_v25 = vrot.slane %v296_v32, 4 }
 0x19b   : > { %v298_v34 = vadd.f32 %v297_v25, %v296_v32  ;;  %v441_v43 = vpop.xlane.xlu0 %440 }
 0x19c   : > { %v520_v0 = vsub.f32 %v441_v43, %v973_v60 }
 0x19d   : > { %v299_v38 = vrot.slane %v298_v34, 2 }
 0x19f   : > { %v300_v22 = vadd.f32 %v299_v38, %v298_v34  ;;  %v990_v38 = vunpack.i.h.bf16 %v1278_v4 }
 0x1a0   : > { %v1280_v46 = vpop.xlane.xlu1 %425 }
 0x1a1   : > { %v301_v39 = vrot.slane %v300_v22, 1 }
 0x1a3   : > { %v302_v41 = vadd.f32 %v301_v39, %v300_v22 }
 0x1a5   : > { %918 = vpush %v302_v41 }
 0x1a8   : > { %v1283_v50 = vpop.xlane.xlu1 %434 }
 0x1b0   : > { %v1286_v58 = vpop.xlane.xlu1 %443 }
 0x1b3   : > { %v677_v44 = vpop.xlane.xlu0 %676 }
 0x1b4   : > { %v753_v3 = vsub.f32 %v677_v44, %v979_v1 }
 0x1b6   : > { %v432_v45 = vpop.xlane.xlu2 %431 }
 0x1b7   : > { %v517_v55 = vsub.f32 %v432_v45, %v966_v53 }
 0x1b8   : > { %v680_v7 = vpop.xlane.xlu1 %679 }
 0x1b9   : > { %v754_v16 = vsub.f32 %v680_v7, %v984_v9 }
 0x1bb   : > { %v683_v47 = vpop.xlane.xlu0 %682 }
 0x1bc   : > { %v755_v27 = vsub.f32 %v683_v47, %v985_v26 }
 0x1be   : > { %v438_v48 = vpop.xlane.xlu2 %437 }
 0x1bf   : > { %v519_v30 = vsub.f32 %v438_v48, %v972_v29 }
 0x1c3   : > { %v686_v51 = vpop.xlane.xlu0 %685 }
 0x1c4   : > { %v756_v52 = vsub.f32 %v686_v51, %v989_v49  ;;  %v695_v44 = vpop.xlane.xlu1 %694  ;;  %v960_v51 = vunpack.i.l.bf16 %v1274_v33 }
 0x1c6   : > { %1012 = vlog2.f32 %v756_v52  ;;  %v447_v54 = vpop.xlane.xlu2 %446  ;;  %v515_v52 = vsub.f32 %v1280_v46, %v960_v51 }
 0x1c7   : > { %1014 = vlog2.f32 %v517_v55 }
 0x1cb   : > { %v689_v61 = vpop.xlane.xlu0 %688 }
 0x1cc   : > { %v1013_v56 = vpop.eup %1012  ;;  %v757_v39 = vsub.f32 %v689_v61, %v990_v38 }
 0x1cd   : > { %v769_v59 = vmul.f32 0.6931472, %v1013_v56  ;;  %v1015_v17 = vpop.eup %1014  ;;  %v967_v56 = vunpack.i.h.bf16 %v1270_v2 }
 0x1ce   : > { %v674_v62 = vpop.xlane.xlu2 %673  ;;  %v529_v5 = vmul.f32 0.6931472, %v1015_v17 }
 0x1cf   : > { %v752_v63 = vsub.f32 %v674_v62, %v978_v57  ;;  %797 = vperm.xlu1 %1002, %v769_v59   ;;  %v518_v57 = vsub.f32 %v1283_v50, %v967_v56  ;;  %v808_v50 = vadd.s32 4294967288, %v1173_v36 }
 0x1d1   : > { %1016 = vlog2.f32 %v752_v63 }
 0x1d2   : > { %1018 = vlog2.f32 %v520_v0 }
 0x1d3   : > { %1020 = vlog2.f32 %v753_v3  ;;  %v692_v13 = vpop.xlane.xlu0 %691 }
 0x1d6   : > { %v993_v6 = vpop.permute.xlu2 %992  ;;  %s919_s9 = spop %918 }
 0x1d7   : > { %v1017_v8 = vpop.eup %1016  ;;  %v994_v10 = vunpack.i.l.bf16 %v993_v6  ;;  %555 = vperm.xlu1 %1002, %v529_v5   ;;  %v995_v42 = vunpack.i.h.bf16 %v993_v6 }
 0x1d8   : > { %v761_v11 = vmul.f32 0.6931472, %v1017_v8  ;;  %v1019_v15 = vpop.eup %1018 }
 0x1d9   : > { %v758_v14 = vsub.f32 %v692_v13, %v994_v10  ;;  %v1021_v19 = vpop.eup %1020  ;;  %v535_v21 = vmul.f32 0.6931472, %v1019_v15  ;;  %v759_v47 = vsub.f32 %v695_v44, %v995_v42 }
 0x1da   : > { %785 = vperm.xlu2 %1001, %v761_v11   ;;  %v763_v24 = vmul.f32 0.6931472, %v1021_v19 }
 0x1db   : > { %1022 = vlog2.f32 %v758_v14 }
 0x1dc   : > { %1024 = vlog2.f32 %v754_v16 }
 0x1dd   : > { %1026 = vlog2.f32 %v516_v23 }
 0x1de   : > { %1028 = vlog2.f32 %v755_v27 }
 0x1df   : > { %564 = vperm.xlu1 %1002, %v535_v21   ;;  %1030 = vlog2.f32 %v519_v30 }
 0x1e0   : > { %1032 = vlog2.f32 %v757_v39 }
 0x1e1   : > { %v1023_v12 = vpop.eup %1022 }
 0x1e2   : > { %788 = vperm.xlu2 %1001, %v763_v24   ;;  %v773_v28 = vmul.f32 0.6931472, %v1023_v12  ;;  %v1025_v20 = vpop.eup %1024 }
 0x1e3   : > { %v1027_v25 = vpop.eup %1026  ;;  %v765_v34 = vmul.f32 0.6931472, %v1025_v20 }
 0x1e4   : > { %803 = vperm.xlu0 %1003, %v773_v28   ;;  %v527_v31 = vmul.f32 0.6931472, %v1027_v25  ;;  %v1029_v40 = vpop.eup %1028 }
 0x1e5   : > { %v1031_v37 = vpop.eup %1030  ;;  %v767_v43 = vmul.f32 0.6931472, %v1029_v40 }
 0x1e6   : > { %v998_v32 = vpop.permute.xlu0 %997  ;;  %v533_v45 = vmul.f32 0.6931472, %v1031_v37  ;;  %v1033_v48 = vpop.eup %1032 }
 0x1e7   : > { %v1000_v22 = vunpack.i.h.bf16 %v998_v32  ;;  %v771_v49 = vmul.f32 0.6931472, %v1033_v48  ;;  %v999_v60 = vunpack.i.l.bf16 %v998_v32 }
 0x1e9   : > { %v522_v41 = vsub.f32 %v447_v54, %v1000_v22  ;;  %v521_v33 = vsub.f32 %v1286_v58, %v999_v60 }
 0x1ea   : > { %791 = vperm.xlu2 %1001, %v765_v34  }
 0x1eb   : > { %1034 = vlog2.f32 %v522_v41 }
 0x1ec   : > { %552 = vperm.xlu0 %1003, %v527_v31   ;;  %1036 = vlog2.f32 %v759_v47 }
 0x1ed   : > { %1038 = vlog2.f32 %v515_v52 }
 0x1ee   : > { %1040 = vlog2.f32 %v518_v57 }
 0x1ef   : > { %1042 = vlog2.f32 %v521_v33 }
 0x1f1   : > { %v1035_v4 = vpop.eup %1034 }
 0x1f2   : > { %794 = vperm.xlu2 %1001, %v767_v43   ;;  %v539_v53 = vmul.f32 0.6931472, %v1035_v4  ;;  %v1037_v54 = vpop.eup %1036 }
 0x1f3   : > { %v775_v55 = vmul.f32 0.6931472, %v1037_v54  ;;  %v1039_v59 = vpop.eup %1038 }
 0x1f4   : > { %561 = vperm.xlu0 %1003, %v533_v45   ;;  %v525_v61 = vmul.f32 0.6931472, %v1039_v59  ;;  %v1041_v62 = vpop.eup %1040 }
 0x1f5   : > { %v531_v46 = vmul.f32 0.6931472, %v1041_v62  ;;  %v1043_v63 = vpop.eup %1042 }
 0x1f6   : > { %v537_v0 = vmul.f32 0.6931472, %v1043_v63 }
 0x1fa   : > { %800 = vperm.xlu2 %1001, %v771_v49  }
 0x1fc   : > { %570 = vperm.xlu0 %1003, %v539_v53  }
 0x202   : > { %806 = vperm.xlu2 %1001, %v775_v55  }
 0x20a   : > { %549 = vperm.xlu2 %1001, %v525_v61  }
 0x212   : > { %558 = vperm.xlu2 %1001, %v531_v46  }
 0x21a   : > { %567 = vperm.xlu2 %1001, %v537_v0  }
 0x234   : > { %v786_v1 = vpop.permute.xlu2 %785 }
 0x235   : > { %v809_v8 = vperm.slane %v786_v1, %v808_v50 }
 0x23c   : > { %v789_v17 = vpop.permute.xlu2 %788 }
 0x23d   : > { %v810_v5 = vperm.slane %v789_v17, %v808_v50 }
 0x23f   : > { %v817_v7 = vsel %vm580_vm9, %v810_v5, %v809_v8 }
 0x241   : > { %v798_v11 = vpop.permute.xlu1 %797 }
 0x242   : > { %v813_v16 = vperm.slane %v798_v11, %v808_v50 }
 0x244   : > { %v792_v2 = vpop.permute.xlu2 %791 }
 0x245   : > { %v811_v6 = vperm.slane %v792_v2, %v808_v50 }
 0x247   : > { %v818_v13 = vsel %vm582_vm11, %v811_v6, %v817_v7 }
 0x249   : > { %v556_v30 = vpop.permute.xlu1 %555 }
 0x24a   : > { %v574_v22 = vperm.slane %v556_v30, %v1173_v36 }
 0x24c   : > { %v795_v3 = vpop.permute.xlu2 %794 }
 0x24d   : > { %v812_v10 = vperm.slane %v795_v3, %v808_v50  ;;  %v841_v3 = vld [vmem:[#allocation3] sm:$0x1] }
 0x24f   : > { %v819_v9 = vsel %vm584_vm12, %v812_v10, %v818_v13 }
 0x250   : > { %v820_v18 = vsel %vm586_vm13, %v813_v16, %v819_v9 }
 0x251   : > { %v565_v41 = vpop.permute.xlu1 %564 }
 0x252   : > { %v577_v44 = vperm.slane %v565_v41, %v1173_v36 }
 0x254   : > { %v801_v58 = vpop.permute.xlu2 %800 }
 0x255   : > { %v814_v14 = vperm.slane %v801_v58, %v808_v50 }
 0x256   : > { %v804_v15 = vpop.permute.xlu0 %803 }
 0x257   : > { %v815_v19 = vperm.slane %v804_v15, %v808_v50  ;;  %v821_v21 = vsel %vm588_vm14, %v814_v14, %v820_v18 }
 0x259   : > { %v822_v12 = vsel %vm590_vm15, %v815_v19, %v821_v21 }
 0x25c   : > { %v807_v23 = vpop.permute.xlu2 %806 }
 0x25d   : > { %v816_v24 = vperm.slane %v807_v23, %v808_v50 }
 0x25e   : > { %v553_v27 = vpop.permute.xlu0 %552 }
 0x25f   : > { %v823_v28 = vsel %vm592_vm0, %v816_v24, %v822_v12  ;;  %v573_v35 = vperm.slane %v553_v27, %v1173_v36 }
 0x260   : > { %v825_v29 = vsel %vm1308_vm2, %v823_v28, 0.0 }
 0x261   : > { %827 = vrot.lane.b32.xlu1 %v825_v29, %s1077_s8 }
 0x264   : > { %v550_v20 = vpop.permute.xlu2 %549 }
 0x265   : > { %v572_v32 = vperm.slane %v550_v20, %v1173_v36 }
 0x266   : > { %v562_v25 = vpop.permute.xlu0 %561 }
 0x267   : > { %v581_v34 = vsel %vm580_vm9, %v573_v35, %v572_v32  ;;  %v576_v42 = vperm.slane %v562_v25, %v1173_v36 }
 0x268   : > { %v583_v39 = vsel %vm582_vm11, %v574_v22, %v581_v34 }
 0x26c   : > { %v559_v38 = vpop.permute.xlu2 %558 }
 0x26d   : > { %v575_v31 = vperm.slane %v559_v38, %v1173_v36 }
 0x26e   : > { %v571_v43 = vpop.permute.xlu0 %570 }
 0x26f   : > { %v585_v40 = vsel %vm584_vm12, %v575_v31, %v583_v39  ;;  %v579_v48 = vperm.slane %v571_v43, %v1173_v36 }
 0x270   : > { %v587_v37 = vsel %vm586_vm13, %v576_v42, %v585_v40 }
 0x271   : > { %v589_v4 = vsel %vm588_vm14, %v577_v44, %v587_v37 }
 0x274   : > { %v568_v45 = vpop.permute.xlu2 %567 }
 0x275   : > { %v578_v47 = vperm.slane %v568_v45, %v1173_v36 }
 0x277   : > { %v591_v49 = vsel %vm590_vm15, %v578_v47, %v589_v4 }
 0x278   : > { %v593_v51 = vsel %vm592_vm0, %v579_v48, %v591_v49 }
 0x279   : > { %v595_v52 = vsel %vm1308_vm2, %v593_v51, 0.0 }
 0x27a   : > { %v597_v53 = vsel %vm596_vm4, %v595_v52, 0.0 }
 0x27b   : > { %598 = vadd.xlane.f32.xlu2 %v597_v53 }
 0x2d3   : > { %v828_v54 = vpop.permute.xlu1 %827 }
 0x2d4   : > { %v830_v55 = vsel %vm596_vm4, %v828_v54, 0.0 }
 0x2d5   : > { %831 = vadd.xlane.f32.xlu0 %v830_v55 }
 0x2ee   : > { %v599_v56 = vpop.xlane.xlu2 %598 }
 0x2ef   : > { %v600_v57 = vrot.slane %v599_v56, 4 }
 0x2f1   : > { %v601_v59 = vadd.f32 %v600_v57, %v599_v56 }
 0x2f3   : > { %v602_v60 = vrot.slane %v601_v59, 2 }
 0x2f5   : > { %v603_v36 = vadd.f32 %v602_v60, %v601_v59 }
 0x2f7   : > { %v604_v61 = vrot.slane %v603_v36, 1 }
 0x2f9   : > { %v605_v33 = vadd.f32 %v604_v61, %v603_v36 }
 0x2fb   : > { %920 = vpush %v605_v33 }
 0x32c   : > { %s921_s10 = spop %920 }
 0x348   : > { %v832_v62 = vpop.xlane.xlu0 %831 }
 0x349   : > { %v833_v46 = vrot.slane %v832_v62, 4 }
 0x34b   : > { %v834_v63 = vadd.f32 %v833_v46, %v832_v62 }
 0x34d   : > { %v835_v0 = vrot.slane %v834_v63, 2 }
 0x34f   : > { %v836_v1 = vadd.f32 %v835_v0, %v834_v63 }
 0x351   : > { %v837_v17 = vrot.slane %v836_v1, 1 }
 0x353   : > { %v838_v2 = vadd.f32 %v837_v17, %v836_v1 }
 0x355   : > { %922 = vpush %v838_v2 }
 0x386   : > { %s923_s11 = spop %922 }
 0x387   : > { %s840_s12 = sadd.f32 %s923_s11, %s921_s10 }
 0x389   : > { %s842_s13 = ssub.f32 %s919_s9, %s840_s12 }
 0x38a   : > { %850 = sbr.rel (%p913_p4) target bundleno = 981 (0x3d5), region = 48 }
 0x38b   : > { %v843_v50 = vstv %s842_s13 }
 0x38c   : > { %v844_v5 = vadd.f32 %v843_v50, %v841_v3 }
 0x38e   : > { %846 = vst.msk [vmem:[#allocation3] sm:$0x1] %vm845_vm3, %v844_v5 }
 0x38f   : > { %v1078_v8 = vmov 240.0  }
 0x390   : > { %1044 = vrcp.f32 %v1078_v8 }
 0x395   : > { %v851_v6 = vld [vmem:[#allocation3] sm:$0x1] }
 0x396   : > { %924 = vpush %v851_v6  ;;  %v1045_v10 = vpop.eup %1044 }
 0x397   : > { %v856_v58 = vmul.f32 240.0, %v1045_v10  ;;  %vm860_vm5 = vweird.f32 %v1045_v10 }
 0x399   : > { %v857_v7 = vsub.f32 1.0, %v856_v58 }
 0x39b   : > { %v858_v11 = vmul.f32 %v1045_v10, %v857_v7 }
 0x39d   : > { %v859_v13 = vadd.f32 %v1045_v10, %v858_v11 }
 0x39f   : > { %v861_v9 = vsel %vm860_vm5, %v1045_v10, %v859_v13 }
 0x3a0   : > { %926 = vpush %v861_v9 }
 0x3c7   : > { %s925_s14 = spop %924 }
 0x3c8   : > { %s854_s15 = ssub.f32 0.0, %s925_s14 }
 0x3d1   : > { %s927_s16 = spop %926 }
 0x3d2   : > { %s863_s17 = smul.f32 %s927_s16, %s854_s15 }
 0x3d4   : > { %865 = sst [smem:[#allocation4]] %s863_s17 }
 0x3d5 PF: > { %p932_p5 = scmp.eq.s32.totalorder %s1116_s19, 1  ;;  %s872_s22 = sshll.u32 %s1346_s5, 4  ;;  %s873_s22 = int_to_ptr.hbm [resolvable:$true] %s872_s22 }
 0x3d6   : > { %s1079_s23 = smov [#allocation4]  }
 0x3d7   : > { %929 = dma.smem_to_hbm (%p932_p5), %s1079_s23, 16, %s873_s22, [#allocation5]  }
 0x3d8   : > { %1065 = dma.done.wait (%p932_p5), [#allocation5], 16  }
 0x3d9   : > { %1067 = vsyncadd (%p932_p5), [#allocation5], 4294967280 }
 0x3da   : > { %881 = sfence }
 0x3db PF: > { %s16_s18 = sadd.s32 1, %s1070_s18  }
 0x3dc   : > { %p13_p6 = scmp.ge.s32.totalorder %s16_s18, 4  }
 0x3de   :  { %15 = sbr.rel (!%p13_p6) target bundleno = 1 (0x1), region = 75 }
 0x3e3   :  { %887 = vsyncpa [#allocation5], 1 }
 0x3e4   :  { %889 = vsyncpa [#allocation5 + $0x1], 1 }

</bundles_post_ra>
